<compile_context>
chip_gen: v7x
topology: tpu7x:2x2x1
jax: 0.10.0
libtpu: 0.0.40
codegen_flags: <defaults>
</compile_context>

<pallas_src>
import functools

import jax
import jax.numpy as jnp
from jax.experimental import pallas as pl
from jax.experimental.pallas import tpu as pltpu

LANES = 128        # every layer width is padded to the 128-lane vreg width
_BIAS_ROWS = 8     # each bias gets a full sublane tile so packed slices stay 8-aligned


def _round_up(x, m):
    return (x + m - 1) // m * m


def init_params(key, input_layer, hidden1, hidden2, out_dim=4):
    """PyTorch nn.Linear-style params: w is [out, in], b is [out]."""
    ks = jax.random.split(key, 6)

    def lin(kw, kb, fan_in, fan_out):
        bound = float(fan_in) ** -0.5
        w = jax.random.uniform(kw, (fan_out, fan_in), jnp.float32, -bound, bound)
        b = jax.random.uniform(kb, (fan_out,), jnp.float32, -bound, bound)
        return w, b

    w1, b1 = lin(ks[0], ks[1], input_layer, hidden1)
    w2, b2 = lin(ks[2], ks[3], hidden1, hidden2)
    w3, b3 = lin(ks[4], ks[5], hidden2, out_dim)
    return (w1, b1, w2, b2, w3, b3)


def pack_params(params):
    """Pre-transpose to [in, out], pad every layer width to 128 lanes, and
    concatenate weights + biases into one [rows, 128] f32 buffer (one DMA)."""
    w1, b1, w2, b2, w3, b3 = params
    in_dim = w1.shape[1]
    h1, h2, out_dim = w1.shape[0], w2.shape[0], w3.shape[0]
    assert max(h1, h2, out_dim) <= LANES, "this kernel packs layer widths into 128 lanes"
    in_p = _round_up(in_dim, 8)

    def pad_w(w_t, rows):  # w_t: [in, out] -> [rows, 128], zero padded
        buf = jnp.zeros((rows, LANES), jnp.float32)
        return buf.at[: w_t.shape[0], : w_t.shape[1]].set(w_t)

    def pad_b(b):          # b: [out] -> [8, 128], row 0 valid
        buf = jnp.zeros((_BIAS_ROWS, LANES), jnp.float32)
        return buf.at[0, : b.shape[0]].set(b)

    packed = jnp.concatenate(
        [pad_w(w1.T, in_p), pad_b(b1),
         pad_w(w2.T, LANES), pad_b(b2),
         pad_w(w3.T, LANES), pad_b(b3)],
        axis=0,
    )
    return packed, in_p


def _mlp_kernel(x_ref, p_ref, o_ref, *, in_p):
    # Static (8-aligned) row offsets into the packed parameter buffer.
    o_w1 = 0
    o_b1 = o_w1 + in_p
    o_w2 = o_b1 + _BIAS_ROWS
    o_b2 = o_w2 + LANES
    o_w3 = o_b2 + _BIAS_ROWS
    o_b3 = o_w3 + LANES

    bf16 = jnp.bfloat16
    x = x_ref[...]                                    # [TB, in_p] f32

    w1 = p_ref[o_w1:o_w1 + in_p, :].astype(bf16)      # [in_p, 128]
    b1 = p_ref[o_b1:o_b1 + 1, :]                      # [1, 128] f32
    w2 = p_ref[o_w2:o_w2 + LANES, :].astype(bf16)     # [128, 128]
    b2 = p_ref[o_b2:o_b2 + 1, :]
    w3 = p_ref[o_w3:o_w3 + LANES, :].astype(bf16)     # [128, 128]
    b3 = p_ref[o_b3:o_b3 + 1, :]

    # MXU in bf16 with f32 accumulation; bias add / ReLU stay in f32.
    h1 = jnp.dot(x.astype(bf16), w1, preferred_element_type=jnp.float32)
    h1 = jnp.maximum(h1 + b1, 0.0)
    h2 = jnp.dot(h1.astype(bf16), w2, preferred_element_type=jnp.float32)
    h2 = jnp.maximum(h2 + b2, 0.0)
    out = jnp.dot(h2.astype(bf16), w3, preferred_element_type=jnp.float32)
    o_ref[...] = (out + b3).astype(o_ref.dtype)       # lane-dense [TB, 128] store


def deep_fully_connected(x, packed, in_p, out_dim=4):
    """x: [B, input_layer] f32 -> [B, out_dim] f32."""
    B, in_dim = x.shape
    total_rows = packed.shape[0]

    # Batch tile: cap the demo tile at 128 rows (raise toward the VMEM budget
    # for large batches); pad B and the feature dim so blocks are (8,128)-legal.
    tb = min(_round_up(B, 8), 128)
    bp = _round_up(B, tb)
    x_pad = jnp.zeros((bp, in_p), x.dtype).at[:B, :in_dim].set(x)

    out = pl.pallas_call(
        functools.partial(_mlp_kernel, in_p=in_p),
        out_shape=jax.ShapeDtypeStruct((bp, LANES), jnp.float32),
        grid_spec=pltpu.PrefetchScalarGridSpec(
            num_scalar_prefetch=0,
            grid=(bp // tb,),
            in_specs=[
                pl.BlockSpec((tb, in_p), lambda i: (i, 0)),           # x: tiled over batch
                pl.BlockSpec((total_rows, LANES), lambda i: (0, 0)),  # params: loaded once, VMEM-resident
            ],
            out_specs=pl.BlockSpec((tb, LANES), lambda i: (i, 0)),    # lane-dense output
        ),
        compiler_params=pltpu.CompilerParams(
            dimension_semantics=("parallel",),   # shard batch tiles across TCs on v7x
        ),
    )(x_pad, packed)
    return out[:B, :out_dim]


def reference(x, params):
    w1, b1, w2, b2, w3, b3 = params
    h1 = jnp.maximum(x @ w1.T + b1, 0.0)
    h2 = jnp.maximum(h1 @ w2.T + b2, 0.0)
    return h2 @ w3.T + b3


if __name__ == "__main__":
    key = jax.random.PRNGKey(0)
    k_x, k_p = jax.random.split(key)

    batch, input_layer, hidden1, hidden2 = 256, 32, 64, 32
    x = jax.random.normal(k_x, (batch, input_layer), jnp.float32)
    params = init_params(k_p, input_layer, hidden1, hidden2)
    packed, in_p = pack_params(params)   # one-time layout plumbing (pre-transpose + pack)

    out = deep_fully_connected(x, packed, in_p, out_dim=4)
    out = jax.block_until_ready(out)

    ref = reference(x, params)
    assert out.shape == (batch, 4)
    # bf16 MXU inputs with f32 accumulation -> relaxed tolerance vs the f32 reference.
    assert jnp.allclose(out, ref, atol=5e-2, rtol=5e-2), float(jnp.max(jnp.abs(out - ref)))
    print("KERNEL_OK")
</pallas_src>

<mosaic_0001>
module attributes {stable_mosaic.version = 11 : i64} {
  func.func @_mlp_kernel(%arg0: i32, %arg1: memref<128x32xf32, #tpu.memory_space<vmem>>, %arg2: memref<312x128xf32, #tpu.memory_space<vmem>>, %arg3: memref<128x128xf32, #tpu.memory_space<vmem>>) attributes {dimension_semantics = [#tpu.dimension_semantics<parallel>], iteration_bounds = array<i64: 2>, scalar_prefetch = 0 : i64, scratch_operands = 0 : i64, tpu.core_type = #tpu.core_type<tc>, window_params = [{transform_indices = @transform_0, window_bounds = array<i64: 128, 32>}, {pipeline_mode = #tpu.pipeline_mode<synchronous>, transform_indices = @transform_1, window_bounds = array<i64: 312, 128>}, {transform_indices = @transform_2, window_bounds = array<i64: 128, 128>}]} {
    %c0 = arith.constant 0 : index
    %c0_0 = arith.constant 0 : index
    %0 = vector.load %arg1[%c0, %c0_0] : memref<128x32xf32, #tpu.memory_space<vmem>>, vector<128x32xf32>
    %c0_1 = arith.constant 0 : index
    %c0_2 = arith.constant 0 : index
    %1 = vector.load %arg2[%c0_1, %c0_2] : memref<312x128xf32, #tpu.memory_space<vmem>>, vector<32x128xf32>
    %2 = arith.truncf %1 : vector<32x128xf32> to vector<32x128xbf16>
    %c32 = arith.constant 32 : index
    %c0_3 = arith.constant 0 : index
    %3 = vector.load %arg2[%c32, %c0_3] : memref<312x128xf32, #tpu.memory_space<vmem>>, vector<1x128xf32>
    %c40 = arith.constant 40 : index
    %c0_4 = arith.constant 0 : index
    %4 = vector.load %arg2[%c40, %c0_4] : memref<312x128xf32, #tpu.memory_space<vmem>>, vector<128x128xf32>
    %5 = arith.truncf %4 : vector<128x128xf32> to vector<128x128xbf16>
    %c168 = arith.constant 168 : index
    %c0_5 = arith.constant 0 : index
    %6 = vector.load %arg2[%c168, %c0_5] : memref<312x128xf32, #tpu.memory_space<vmem>>, vector<1x128xf32>
    %c176 = arith.constant 176 : index
    %c0_6 = arith.constant 0 : index
    %7 = vector.load %arg2[%c176, %c0_6] : memref<312x128xf32, #tpu.memory_space<vmem>>, vector<128x128xf32>
    %8 = arith.truncf %7 : vector<128x128xf32> to vector<128x128xbf16>
    %c304 = arith.constant 304 : index
    %c0_7 = arith.constant 0 : index
    %9 = vector.load %arg2[%c304, %c0_7] : memref<312x128xf32, #tpu.memory_space<vmem>>, vector<1x128xf32>
    %10 = arith.truncf %0 : vector<128x32xf32> to vector<128x32xbf16>
    %cst = arith.constant dense<0.000000e+00> : vector<128x128xf32>
    %11 = tpu.matmul %10, %2, %cst {dimension_numbers = #tpu.dot_dimension_numbers<[1], [0], [0], [1], [0, 0, 1, 1], [], []>} : vector<128x32xbf16>, vector<32x128xbf16>, vector<128x128xf32> -> vector<128x128xf32>
    %12 = vector.broadcast %3 : vector<1x128xf32> to vector<128x128xf32>
    %13 = arith.addf %11, %12 : vector<128x128xf32>
    %cst_8 = arith.constant 0.000000e+00 : f32
    %14 = vector.broadcast %cst_8 : f32 to vector<128x128xf32>
    %15 = arith.maximumf %13, %14 : vector<128x128xf32>
    %16 = arith.truncf %15 : vector<128x128xf32> to vector<128x128xbf16>
    %cst_9 = arith.constant dense<0.000000e+00> : vector<128x128xf32>
    %17 = tpu.matmul %16, %5, %cst_9 {dimension_numbers = #tpu.dot_dimension_numbers<[1], [0], [0], [1], [0, 0, 1, 1], [], []>} : vector<128x128xbf16>, vector<128x128xbf16>, vector<128x128xf32> -> vector<128x128xf32>
    %18 = vector.broadcast %6 : vector<1x128xf32> to vector<128x128xf32>
    %19 = arith.addf %17, %18 : vector<128x128xf32>
    %cst_10 = arith.constant 0.000000e+00 : f32
    %20 = vector.broadcast %cst_10 : f32 to vector<128x128xf32>
    %21 = arith.maximumf %19, %20 : vector<128x128xf32>
    %22 = arith.truncf %21 : vector<128x128xf32> to vector<128x128xbf16>
    %cst_11 = arith.constant dense<0.000000e+00> : vector<128x128xf32>
    %23 = tpu.matmul %22, %8, %cst_11 {dimension_numbers = #tpu.dot_dimension_numbers<[1], [0], [0], [1], [0, 0, 1, 1], [], []>} : vector<128x128xbf16>, vector<128x128xbf16>, vector<128x128xf32> -> vector<128x128xf32>
    %24 = vector.broadcast %9 : vector<1x128xf32> to vector<128x128xf32>
    %25 = arith.addf %23, %24 : vector<128x128xf32>
    %c0_12 = arith.constant 0 : index
    %c0_13 = arith.constant 0 : index
    %26 = vector.load %arg3[%c0_12, %c0_13] : memref<128x128xf32, #tpu.memory_space<vmem>>, vector<128x128xf32>
    tpu.vector_store %arg3[%c0_12, %c0_13], %25 {strides = array<i32>} : memref<128x128xf32, #tpu.memory_space<vmem>>, vector<128x128xf32>,
    return
  }
  func.func @transform_0(%arg0: i32) -> (i32, i32) {
    %c0_i32 = arith.constant 0 : i32
    %c0_i32_0 = arith.constant 0 : i32
    return %arg0, %c0_i32 : i32, i32
  }
  func.func @transform_1(%arg0: i32) -> (i32, i32) {
    %c0_i32 = arith.constant 0 : i32
    %c0_i32_0 = arith.constant 0 : i32
    %c0_i32_1 = arith.constant 0 : i32
    return %c0_i32, %c0_i32_0 : i32, i32
  }
  func.func @transform_2(%arg0: i32) -> (i32, i32) {
    %c0_i32 = arith.constant 0 : i32
    %c0_i32_0 = arith.constant 0 : i32
    return %arg0, %c0_i32 : i32, i32
  }
}

</mosaic_0001>

<bundles_post_ra>
// kernel: tpu_custom_call.1
= control target key start
LH: loop header
LB: loop body
LE: loop exit
PB: predicated region body
PF: predicated region fallthrough
CT: control target
= control target key end

     0   :  { %7 = vsyncpa [#allocation3], 0  ;;  %s1236_s0 = inlined_call_operand.vmem [shape: f32[256,32], index: 0, kind: input, shape index: {}]   ;;  %s1237_s1 = inlined_call_operand.vmem [shape: f32[312,128], index: 1, kind: input, shape index: {}]   ;;  %s1238_s2 = inlined_call_operand.hbm [shape: f32[256,128], index: 2, kind: output, shape index: {}]  }
   0x1   :  { %9 = vsyncpa [#allocation3 + $0x1], 0  ;;  %s968_s9 = smov 0   ;;  %s970_s10 = smov 0  }
   0x2   :  { %s972_s11 = smov 0   ;;  %s974_s12 = smov 0  }
   0x3 LB: > { %s989_s13 = sadd.s32 4294967295, %s948_s12   ;;  %s695_s14 = sadd.s32 4294967294, %s948_s12   ;;  %s948_s12 = sphi %s974_s12, %s1244_s12   ;;  %s944_s11 = sphi %s972_s11, %s1243_s11   ;;  %s940_s10 = sphi %s970_s10, %s1242_s10   ;;  %s936_s9 = sphi %s968_s9, %s1241_s9  }
   0x4   : > { %s993_s15 = sadd.s32 1, %s948_s12   ;;  %s69_s16 = sadd.s32 1, %s944_s11 }
   0x5   : > { %s66_s17 = ssub.s32 %s948_s12, %s993_s15  ;;  %p79_p0 = scmp.ne.s32.totalorder %s944_s11, %s940_s10 }
   0x6   : > { %p67_p1 = scmp.eq.s32.totalorder %s66_s17, 0  ;;  %p80_p2 = scmp.eq.s32.totalorder %s989_s13, 1 }
   0x7   : > { %p85_p3 = scmp.ne.s32.totalorder %s940_s10, %s936_s9  ;;  %p86_p4 = scmp.eq.s32.totalorder %s695_s14, 1 }
   0x8   : > { %s1004_s18 = scalar_select %p67_p1, %s944_s11, %s69_s16  }
   0x9   : > { %p1006_p5 = por %p80_p2, %p79_p0  ;;  %p1010_p6 = por %p86_p4, %p85_p3 }
   0xa   : > { %p698_p7 = scmp.ge.s32.totalorder %s948_s12, 1  ;;  %p116_p8 = scmp.lt.s32.totalorder %s948_s12, 3 }
   0xc   : > { %p117_p9 = pnand %p698_p7, %p116_p8 }
   0xd   : > { %v162_v0 = vld [vmem:[%s1237_s1] sm:$0xff] (!%p117_p9)  ;;  %v163_v1 = vld [vmem:[%s1237_s1 + $0x8] sm:$0xff] (!%p117_p9)  ;;  %v164_v2 = vld [vmem:[%s1237_s1 + $0x10] sm:$0xff] (!%p117_p9)  ;;  %s700_s27 = sshll.u32 (!%p117_p9), %s989_s13, 4  ;;  %vm231_vm0 = vcmask (!%p117_p9), 261120   ;;  %s135_s28 = sand.u32 (!%p117_p9), 1, %s940_s10  }
   0xe   : > { %120 = sbr.rel (%p117_p9) target bundleno = 728 (0x2d8), region = 28  ;;  %v166_v3 = vpack.c.bf16 (!%p117_p9), %v163_v1, %v162_v0  ;;  %v165_v4 = vld [vmem:[%s1237_s1 + $0x18] sm:$0xff] (!%p117_p9)  ;;  %p139_p10 = scmp.lt.s32.totalorder (!%p117_p9), %s700_s27, 31  ;;  %v169_v5 = vld [vmem:[%s1237_s1 + $0x28] sm:$0xff] (!%p117_p9)  ;;  %v170_v6 = vld [vmem:[%s1237_s1 + $0x30] sm:$0xff] (!%p117_p9) }
   0xf   : > { %v167_v7 = vpack.c.bf16 (!%p117_p9), %v165_v4, %v164_v2  ;;  %v185_v8 = vpack.c.bf16 (!%p117_p9), %v170_v6, %v169_v5  ;;  %v171_v9 = vld [vmem:[%s1237_s1 + $0x38] sm:$0xff] (!%p117_p9)  ;;  %v172_v10 = vld [vmem:[%s1237_s1 + $0x40] sm:$0xff] (!%p117_p9)  ;;  %v173_v12 = vld [vmem:[%s1237_s1 + $0x48] sm:$0xff] (!%p117_p9)  ;;  %s718_s3 = sshll.u32 (!%p117_p9), %s989_s13, 11  ;;  %s1195_s13 = scalar_lea.sflag (!%p117_p9), [#allocation3], %s135_s28 }
  0x10   : > { %761 = vmatprep.subr.bf16.mxu0 (!%p117_p9), %v166_v3  ;;  %v186_v11 = vpack.c.bf16 (!%p117_p9), %v172_v10, %v171_v9  ;;  %v174_v13 = vld [vmem:[%s1237_s1 + $0x50] sm:$0xff] (!%p117_p9)  ;;  %v175_v15 = vld [vmem:[%s1237_s1 + $0x58] sm:$0xff] (!%p117_p9)  ;;  %v176_v16 = vld [vmem:[%s1237_s1 + $0x60] sm:$0xff] (!%p117_p9)  ;;  %s1186_s7 = scalar_lea.hbm (!%p117_p9), %s1238_s2, %s718_s3  ;;  %s950_s14 = smov (!%p117_p9), [#allocation2]  }
  0x11   : > { %762 = vmatpush3.bf16.msra.mxu0 (!%p117_p9), %v166_v3  ;;  %781 = vmatprep.subr.bf16.mxu1 (!%p117_p9), %v185_v8  ;;  %v187_v14 = vpack.c.bf16 (!%p117_p9), %v174_v13, %v173_v12  ;;  %v188_v26 = vpack.c.bf16 (!%p117_p9), %v176_v16, %v175_v15  ;;  %v177_v27 = vld [vmem:[%s1237_s1 + $0x68] sm:$0xff] (!%p117_p9)  ;;  %v178_v28 = vld [vmem:[%s1237_s1 + $0x70] sm:$0xff] (!%p117_p9)  ;;  %v179_v35 = vld [vmem:[%s1237_s1 + $0x78] sm:$0xff] (!%p117_p9)  ;;  %s890_s16 = sshll.u32 (!%p117_p9), %s950_s14, 4  ;;  %s891_s16 = int_to_ptr.vmem [resolvable:$false] %s890_s16 }
  0x12   : > { %763 = vmatprep.subr.bf16.mxu0 (!%p117_p9), %v167_v7  ;;  %782 = vmatpush3.bf16.msra.mxu1 (!%p117_p9), %v185_v8  ;;  %v189_v33 = vpack.c.bf16 (!%p117_p9), %v178_v28, %v177_v27  ;;  %v180_v36 = vld [vmem:[%s1237_s1 + $0x80] sm:$0xff] (!%p117_p9)  ;;  %v181_v48 = vld [vmem:[%s1237_s1 + $0x88] sm:$0xff] (!%p117_p9)  ;;  %v182_v49 = vld [vmem:[%s1237_s1 + $0x90] sm:$0xff] (!%p117_p9)  ;;  %s892_s17 = scalar_lea.vmem (!%p117_p9), %s891_s16, 4096 }
  0x13   : > { %783 = vmatprep.subr.bf16.mxu1 (!%p117_p9), %v186_v11  ;;  %v190_v38 = vpack.c.bf16 (!%p117_p9), %v180_v36, %v179_v35  ;;  %v191_v50 = vpack.c.bf16 (!%p117_p9), %v182_v49, %v181_v48  ;;  %v183_v51 = vld [vmem:[%s1237_s1 + $0x98] sm:$0xff] (!%p117_p9)  ;;  %v184_v52 = vld [vmem:[%s1237_s1 + $0xa0] sm:$0xff] (!%p117_p9)  ;;  %v194_v54 = vld [vmem:[%s1237_s1 + $0xb0] sm:$0xff] (!%p117_p9) }
  0x14   : > { %v192_v53 = vpack.c.bf16 (!%p117_p9), %v184_v52, %v183_v51  ;;  %v195_v55 = vld [vmem:[%s1237_s1 + $0xb8] sm:$0xff] (!%p117_p9)  ;;  %v196_v56 = vld [vmem:[%s1237_s1 + $0xc0] sm:$0xff] (!%p117_p9)  ;;  %v197_v58 = vld [vmem:[%s1237_s1 + $0xc8] sm:$0xff] (!%p117_p9) }
  0x15   : > { %s1246_s27 = smov (!%p139_p10, %s700_s27), 31  ;;  %764 = vmatpush3.bf16.msra.mxu0 %v167_v7  ;;  %v210_v57 = vpack.c.bf16 %v195_v55, %v194_v54  ;;  %v211_v59 = vpack.c.bf16 %v197_v58, %v196_v56  ;;  %v198_v60 = vld [vmem:[%s1237_s1 + $0xd0] sm:$0xff]  ;;  %v199_v61 = vld [vmem:[%s1237_s1 + $0xd8] sm:$0xff]  ;;  %v200_v63 = vld [vmem:[%s1237_s1 + $0xe0] sm:$0xff] }
  0x16   : > { %s701_s23 = sshll.u32 %s1246_s27, 3  ;;  %784 = vmatpush3.bf16.msra.mxu1 %v186_v11  ;;  %v212_v62 = vpack.c.bf16 %v199_v61, %v198_v60  ;;  %v201_v0 = vld [vmem:[%s1237_s1 + $0xe8] sm:$0xff]  ;;  %v202_v2 = vld [vmem:[%s1237_s1 + $0xf0] sm:$0xff]  ;;  %v203_v3 = vld [vmem:[%s1237_s1 + $0xf8] sm:$0xff] }
  0x17   : > { %s1050_s26 = scalar_lea.vmem %s1236_s0, %s701_s23  ;;  %785 = vmatprep.subr.bf16.mxu1 %v187_v14  ;;  %813 = vmatprep.subr.bf16.mxu0 %v210_v57  ;;  %v213_v1 = vpack.c.bf16 %v201_v0, %v200_v63  ;;  %v214_v4 = vpack.c.bf16 %v203_v3, %v202_v2  ;;  %v204_v5 = vld [vmem:[%s1237_s1 + $0x100] sm:$0xff]  ;;  %v205_v6 = vld [vmem:[%s1237_s1 + $0x108] sm:$0xff]  ;;  %v207_v2 = vld [vmem:[%s1237_s1 + $0x118] sm:$0xff] }
  0x18   : > { %v146_v17 = vld [vmem:[%s1050_s26] sm:$0xff]  ;;  %v147_v18 = vld [vmem:[%s1050_s26 + $0x8] sm:$0xff]  ;;  %v148_v19 = vld [vmem:[%s1050_s26 + $0x10] sm:$0xff]  ;;  %v215_v7 = vpack.c.bf16 %v205_v6, %v204_v5 }
  0x19   : > { %v219_v20 = vpack.c.bf16 %v147_v18, %v146_v17  ;;  %v149_v21 = vld [vmem:[%s1050_s26 + $0x18] sm:$0xff]  ;;  %v150_v22 = vld [vmem:[%s1050_s26 + $0x20] sm:$0xff]  ;;  %v151_v23 = vld [vmem:[%s1050_s26 + $0x28] sm:$0xff] }
  0x1a   : > { %v220_v24 = vpack.c.bf16 %v149_v21, %v148_v19  ;;  %v221_v25 = vpack.c.bf16 %v151_v23, %v150_v22  ;;  %v152_v29 = vld [vmem:[%s1050_s26 + $0x30] sm:$0xff]  ;;  %v153_v30 = vld [vmem:[%s1050_s26 + $0x38] sm:$0xff]  ;;  %v154_v31 = vld [vmem:[%s1050_s26 + $0x40] sm:$0xff]  ;;  %786 = vmatpush3.bf16.msra.mxu1 %v187_v14 }
  0x1b   : > { %765 = vmatprep.mubr.msk.bf16.mxu0 %vm231_vm0, %v219_v20  ;;  %v155_v32 = vld [vmem:[%s1050_s26 + $0x48] sm:$0xff]  ;;  %787 = vmatprep.subr.bf16.mxu1 %v188_v26  ;;  %v222_v34 = vpack.c.bf16 %v153_v30, %v152_v29  ;;  %v156_v39 = vld [vmem:[%s1050_s26 + $0x50] sm:$0xff]  ;;  %v157_v40 = vld [vmem:[%s1050_s26 + $0x58] sm:$0xff] }
  0x1c   : > { %766 = vmatmul.mubr.msk.bf16.vlgmr.msra.gmra.mrb[0].mxu0 %vm231_vm0, %v220_v24  ;;  %v223_v37 = vpack.c.bf16 %v155_v32, %v154_v31  ;;  %v158_v41 = vld [vmem:[%s1050_s26 + $0x60] sm:$0xff]  ;;  %v159_v42 = vld [vmem:[%s1050_s26 + $0x68] sm:$0xff]  ;;  %v224_v43 = vpack.c.bf16 %v157_v40, %v156_v39  ;;  %v160_v45 = vld [vmem:[%s1050_s26 + $0x70] sm:$0xff] }
  0x1d   : > { %769 = vmatprep.mubr.msk.bf16.mxu0 %vm231_vm0, %v221_v25  ;;  %v225_v44 = vpack.c.bf16 %v159_v42, %v158_v41  ;;  %v161_v46 = vld [vmem:[%s1050_s26 + $0x78] sm:$0xff]  ;;  %814 = vmatpush3.bf16.msra.mxu0 %v210_v57  ;;  %v702_v8 = vld [vmem:[%s1237_s1 + $0x20] ss:$0 sm:$0xff]  ;;  %v209_v5 = vld [vmem:[%s1237_s1 + $0x128] sm:$0xff]  ;;  %s699_s26 = sshll.u32 %s135_s28, 7 }
  0x1e   : > { %788 = vmatpush3.bf16.msra.mxu1 %v188_v26  ;;  %v226_v47 = vpack.c.bf16 %v161_v46, %v160_v45  ;;  %815 = vmatprep.subr.bf16.mxu0 %v211_v59  ;;  %s1166_s27 = scalar_lea.vmem [#allocation2], %s699_s26 }
  0x1f   : > { %789 = vmatprep.subr.bf16.mxu1 %v189_v33  ;;  %s633_s4 = sshll.u32 %s1166_s27, 4  ;;  %s1188_s4 = int_to_ptr.vmem [resolvable:$true] %s633_s4 }
  0x20   : > { %s886_s8 = scalar_lea.vmem %s1188_s4, 2048  ;;  %p893_p0 = scmp.lt.s32.totalorder %s1188_s4, %s891_s16 }
  0x21   : > { %816 = vmatpush3.bf16.msra.mxu0 %v211_v59  ;;  %p887_p11 = scmp.ne.s32.totalorder %s1188_s4, %s886_s8  ;;  %p894_p1 = scmp.lt.s32.totalorder %s892_s17, %s886_s8 }
  0x22   : > { %790 = vmatpush3.bf16.msra.mxu1 %v189_v33  ;;  %817 = vmatprep.subr.bf16.mxu0 %v212_v62 }
  0x23   : > { %791 = vmatprep.subr.bf16.mxu1 %v190_v38  ;;  %p888_p12 = pnand %p887_p11, %p1006_p5  ;;  %p895_p2 = por %p894_p1, %p893_p0 }
  0x24   : > { %770 = vmatmul.mubr.msk.bf16.gmra.mrb[4].mxu0 %vm231_vm0, %v222_v34 }
  0x25   : > { %773 = vmatprep.mubr.msk.bf16.mxu0 %vm231_vm0, %v223_v37  ;;  %818 = vmatpush3.bf16.msra.mxu0 %v212_v62  ;;  %p889_p13 = pneg %p888_p12 }
  0x26   : > { %792 = vmatpush3.bf16.msra.mxu1 %v190_v38  ;;  %819 = vmatprep.subr.bf16.mxu0 %v213_v1 }
  0x27   : > { %793 = vmatprep.subr.bf16.mxu1 %v191_v50  ;;  %p896_p3 = pnand %p895_p2, %p889_p13 }
  0x29   : > { %820 = vmatpush3.bf16.msra.mxu0 %v213_v1  ;;  %v206_v1 = vld [vmem:[%s1237_s1 + $0x110] sm:$0xff] }
  0x2a   : > { %794 = vmatpush3.bf16.msra.mxu1 %v191_v50  ;;  %821 = vmatprep.subr.bf16.mxu0 %v214_v4  ;;  %v216_v3 = vpack.c.bf16 %v207_v2, %v206_v1 }
  0x2b   : > { %795 = vmatprep.subr.bf16.mxu1 %v192_v53 }
  0x2c   : > { %774 = vmatmul.mubr.msk.bf16.gmra.mrb[8].mxu0 %vm231_vm0, %v224_v43 }
  0x2d   : > { %777 = vmatprep.mubr.msk.bf16.mxu0 %vm231_vm0, %v225_v44  ;;  %822 = vmatpush3.bf16.msra.mxu0 %v214_v4  ;;  %v208_v4 = vld [vmem:[%s1237_s1 + $0x120] sm:$0xff] }
  0x2e   : > { %796 = vmatpush3.bf16.msra.mxu1 %v192_v53  ;;  %823 = vmatprep.subr.bf16.mxu0 %v215_v7  ;;  %v217_v6 = vpack.c.bf16 %v209_v5, %v208_v4 }
  0x31   : > { %824 = vmatpush3.bf16.msra.mxu0 %v215_v7  ;;  %v711_v7 = vld [vmem:[%s1237_s1 + $0xa8] ss:$0 sm:$0xff] }
  0x32   : > { %825 = vmatprep.subr.bf16.mxu0 %v216_v3 }
  0x34   : > { %778 = vmatmul.mubr.msk.bf16.gmra.mrb[12].mxu0 %vm231_vm0, %v226_v47 }
  0x35   : > { %826 = vmatpush3.bf16.msra.mxu0 %v216_v3 }
  0x36   : > { %827 = vmatprep.subr.bf16.mxu0 %v217_v6 }
  0x39   : > { %828 = vmatpush3.bf16.msra.mxu0 %v217_v6 }
  0xef   : > { %v767_v9 = vpop.f32.mrb[0].mxu0 }
  0xf0   : > { %v299_v10 = vadd.f32 %v767_v9, %v702_v8  ;;  %v290_v11 = vpop.f32.mrb[1].mxu0 }
  0xf1   : > { %v291_v12 = vadd.f32 %v702_v8, %v290_v11  ;;  %v768_v13 = vpop.f32.mrb[2].mxu0 }
  0xf2   : > { %v302_v14 = vadd.f32 %v768_v13, %v702_v8  ;;  %v293_v15 = vpop.f32.mrb[3].mxu0  ;;  %v355_v17 = vmax.f32 %v299_v10, 0.0 }
  0xf3   : > { %v294_v16 = vadd.f32 %v702_v8, %v293_v15  ;;  %v353_v19 = vmax.f32 %v291_v12, 0.0 }
  0xf4   : > { %v356_v18 = vmax.f32 %v302_v14, 0.0 }
  0xf5   : > { %v354_v20 = vmax.f32 %v294_v16, 0.0 }
  0xf6   : > { %v370_v21 = vpack.c.bf16 %v356_v18, %v355_v17 }
  0xf7   : > { %v771_v22 = vpop.f32.mrb[4].mxu0  ;;  %v369_v23 = vpack.c.bf16 %v354_v20, %v353_v19 }
  0xf8   : > { %v315_v24 = vadd.f32 %v771_v22, %v702_v8  ;;  %v306_v25 = vpop.f32.mrb[5].mxu0 }
  0xf9   : > { %v307_v26 = vadd.f32 %v702_v8, %v306_v25  ;;  %v772_v27 = vpop.f32.mrb[6].mxu0  ;;  %797 = vmatprep.mubr.bf16.mxu1 %v369_v23 }
  0xfa   : > { %v318_v28 = vadd.f32 %v772_v27, %v702_v8  ;;  %v309_v29 = vpop.f32.mrb[7].mxu0  ;;  %798 = vmatmul.mubr.bf16.vlgmr.msra.gmra.mrb[0].mxu1 %v370_v21  ;;  %v359_v31 = vmax.f32 %v315_v24, 0.0 }
  0xfb   : > { %v310_v30 = vadd.f32 %v702_v8, %v309_v29  ;;  %v357_v33 = vmax.f32 %v307_v26, 0.0 }
  0xfc   : > { %v360_v32 = vmax.f32 %v318_v28, 0.0 }
  0xfd   : > { %v358_v34 = vmax.f32 %v310_v30, 0.0 }
  0xfe   : > { %v372_v35 = vpack.c.bf16 %v360_v32, %v359_v31 }
  0xff   : > { %v371_v36 = vpack.c.bf16 %v358_v34, %v357_v33  ;;  %v775_v37 = vpop.f32.mrb[8].mxu0 }
 0x100   : > { %v331_v38 = vadd.f32 %v775_v37, %v702_v8  ;;  %v322_v39 = vpop.f32.mrb[9].mxu0 }
 0x101   : > { %v323_v40 = vadd.f32 %v702_v8, %v322_v39  ;;  %v776_v41 = vpop.f32.mrb[10].mxu0  ;;  %801 = vmatprep.mubr.bf16.mxu1 %v371_v36 }
 0x102   : > { %v334_v42 = vadd.f32 %v776_v41, %v702_v8  ;;  %v325_v43 = vpop.f32.mrb[11].mxu0  ;;  %802 = vmatmul.mubr.bf16.gmra.mrb[4].mxu1 %v372_v35  ;;  %v363_v45 = vmax.f32 %v331_v38, 0.0 }
 0x103   : > { %v326_v44 = vadd.f32 %v702_v8, %v325_v43  ;;  %v361_v47 = vmax.f32 %v323_v40, 0.0 }
 0x104   : > { %v364_v46 = vmax.f32 %v334_v42, 0.0 }
 0x105   : > { %v362_v48 = vmax.f32 %v326_v44, 0.0 }
 0x106   : > { %v374_v49 = vpack.c.bf16 %v364_v46, %v363_v45 }
 0x107   : > { %v373_v50 = vpack.c.bf16 %v362_v48, %v361_v47  ;;  %v779_v51 = vpop.f32.mrb[12].mxu0 }
 0x108   : > { %v347_v52 = vadd.f32 %v779_v51, %v702_v8  ;;  %v338_v53 = vpop.f32.mrb[13].mxu0 }
 0x109   : > { %v339_v54 = vadd.f32 %v702_v8, %v338_v53  ;;  %v780_v55 = vpop.f32.mrb[14].mxu0  ;;  %805 = vmatprep.mubr.bf16.mxu1 %v373_v50 }
 0x10a   : > { %v350_v56 = vadd.f32 %v780_v55, %v702_v8  ;;  %v341_v57 = vpop.f32.mrb[15].mxu0  ;;  %806 = vmatmul.mubr.bf16.gmra.mrb[8].mxu1 %v374_v49  ;;  %v367_v59 = vmax.f32 %v347_v52, 0.0 }
 0x10b   : > { %v342_v58 = vadd.f32 %v702_v8, %v341_v57  ;;  %v365_v61 = vmax.f32 %v339_v54, 0.0 }
 0x10c   : > { %v368_v60 = vmax.f32 %v350_v56, 0.0 }
 0x10d   : > { %v366_v62 = vmax.f32 %v342_v58, 0.0 }
 0x10e   : > { %v376_v63 = vpack.c.bf16 %v368_v60, %v367_v59 }
 0x10f   : > { %v375_v0 = vpack.c.bf16 %v366_v62, %v365_v61 }
 0x111   : > { %809 = vmatprep.mubr.bf16.mxu1 %v375_v0  ;;  %v712_v0 = vld [vmem:[%s1237_s1 + $0x130] ss:$0 sm:$0xff] }
 0x112   : > { %810 = vmatmul.mubr.bf16.gmra.mrb[12].mxu1 %v376_v63 }
 0x1cd   : > { %v799_v8 = vpop.f32.mrb[0].mxu1 }
 0x1ce   : > { %v424_v9 = vadd.f32 %v799_v8, %v711_v7  ;;  %v415_v10 = vpop.f32.mrb[1].mxu1 }
 0x1cf   : > { %v416_v11 = vadd.f32 %v711_v7, %v415_v10  ;;  %v800_v12 = vpop.f32.mrb[2].mxu1 }
 0x1d0   : > { %v427_v13 = vadd.f32 %v800_v12, %v711_v7  ;;  %v418_v14 = vpop.f32.mrb[3].mxu1  ;;  %v480_v16 = vmax.f32 %v424_v9, 0.0 }
 0x1d1   : > { %v419_v15 = vadd.f32 %v711_v7, %v418_v14  ;;  %v478_v18 = vmax.f32 %v416_v11, 0.0 }
 0x1d2   : > { %v481_v17 = vmax.f32 %v427_v13, 0.0 }
 0x1d3   : > { %v479_v19 = vmax.f32 %v419_v15, 0.0 }
 0x1d4   : > { %v495_v20 = vpack.c.bf16 %v481_v17, %v480_v16 }
 0x1d5   : > { %v494_v21 = vpack.c.bf16 %v479_v19, %v478_v18  ;;  %v803_v22 = vpop.f32.mrb[4].mxu1 }
 0x1d6   : > { %v440_v23 = vadd.f32 %v803_v22, %v711_v7  ;;  %v431_v24 = vpop.f32.mrb[5].mxu1 }
 0x1d7   : > { %v432_v25 = vadd.f32 %v711_v7, %v431_v24  ;;  %v804_v26 = vpop.f32.mrb[6].mxu1  ;;  %829 = vmatprep.mubr.bf16.mxu0 %v494_v21 }
 0x1d8   : > { %v443_v27 = vadd.f32 %v804_v26, %v711_v7  ;;  %v434_v28 = vpop.f32.mrb[7].mxu1  ;;  %830 = vmatmul.mubr.bf16.vlgmr.msra.gmra.mrb[16].mxu0 %v495_v20  ;;  %v484_v30 = vmax.f32 %v440_v23, 0.0 }
 0x1d9   : > { %v435_v29 = vadd.f32 %v711_v7, %v434_v28  ;;  %v482_v32 = vmax.f32 %v432_v25, 0.0 }
 0x1da   : > { %v485_v31 = vmax.f32 %v443_v27, 0.0 }
 0x1db   : > { %v483_v33 = vmax.f32 %v435_v29, 0.0 }
 0x1dc   : > { %v497_v34 = vpack.c.bf16 %v485_v31, %v484_v30 }
 0x1dd   : > { %v496_v35 = vpack.c.bf16 %v483_v33, %v482_v32  ;;  %v807_v36 = vpop.f32.mrb[8].mxu1 }
 0x1de   : > { %v456_v37 = vadd.f32 %v807_v36, %v711_v7  ;;  %v447_v38 = vpop.f32.mrb[9].mxu1 }
 0x1df   : > { %v448_v39 = vadd.f32 %v711_v7, %v447_v38  ;;  %v808_v40 = vpop.f32.mrb[10].mxu1  ;;  %833 = vmatprep.mubr.bf16.mxu0 %v496_v35 }
 0x1e0   : > { %v459_v41 = vadd.f32 %v808_v40, %v711_v7  ;;  %v450_v42 = vpop.f32.mrb[11].mxu1  ;;  %834 = vmatmul.mubr.bf16.gmra.mrb[20].mxu0 %v497_v34  ;;  %v488_v44 = vmax.f32 %v456_v37, 0.0 }
 0x1e1   : > { %v451_v43 = vadd.f32 %v711_v7, %v450_v42  ;;  %v486_v46 = vmax.f32 %v448_v39, 0.0 }
 0x1e2   : > { %v489_v45 = vmax.f32 %v459_v41, 0.0 }
 0x1e3   : > { %v487_v47 = vmax.f32 %v451_v43, 0.0 }
 0x1e4   : > { %v499_v48 = vpack.c.bf16 %v489_v45, %v488_v44 }
 0x1e5   : > { %v498_v49 = vpack.c.bf16 %v487_v47, %v486_v46  ;;  %v811_v50 = vpop.f32.mrb[12].mxu1 }
 0x1e6   : > { %v472_v51 = vadd.f32 %v811_v50, %v711_v7  ;;  %v463_v52 = vpop.f32.mrb[13].mxu1 }
 0x1e7   : > { %v464_v53 = vadd.f32 %v711_v7, %v463_v52  ;;  %v812_v54 = vpop.f32.mrb[14].mxu1  ;;  %837 = vmatprep.mubr.bf16.mxu0 %v498_v49 }
 0x1e8   : > { %v475_v55 = vadd.f32 %v812_v54, %v711_v7  ;;  %v466_v56 = vpop.f32.mrb[15].mxu1  ;;  %838 = vmatmul.mubr.bf16.gmra.mrb[24].mxu0 %v499_v48  ;;  %v492_v58 = vmax.f32 %v472_v51, 0.0 }
 0x1e9   : > { %v467_v57 = vadd.f32 %v711_v7, %v466_v56  ;;  %v490_v60 = vmax.f32 %v464_v53, 0.0 }
 0x1ea   : > { %v493_v59 = vmax.f32 %v475_v55, 0.0 }
 0x1eb   : > { %v491_v61 = vmax.f32 %v467_v57, 0.0 }
 0x1ec   : > { %v501_v62 = vpack.c.bf16 %v493_v59, %v492_v58 }
 0x1ed   : > { %v500_v63 = vpack.c.bf16 %v491_v61, %v490_v60 }
 0x1ef   : > { %841 = vmatprep.mubr.bf16.mxu0 %v500_v63 }
 0x1f0   : > { %842 = vmatmul.mubr.bf16.gmra.mrb[28].mxu0 %v501_v62 }
 0x2ab   : > { %v831_v1 = vpop.f32.mrb[16].mxu0 }
 0x2ac   : > { %v549_v2 = vadd.f32 %v831_v1, %v712_v0  ;;  %v540_v3 = vpop.f32.mrb[17].mxu0 }
 0x2ad   : > { %v541_v4 = vadd.f32 %v712_v0, %v540_v3  ;;  %v832_v5 = vpop.f32.mrb[18].mxu0 }
 0x2ae   : > { %605 = vst [vmem:[%s1166_s27 + $0x10] sm:$0xff] %v549_v2  ;;  %v552_v6 = vadd.f32 %v832_v5, %v712_v0  ;;  %v543_v7 = vpop.f32.mrb[19].mxu0 }
 0x2af   : > { %603 = vst [vmem:[%s1166_s27] sm:$0xff] %v541_v4  ;;  %v544_v8 = vadd.f32 %v712_v0, %v543_v7 }
 0x2b0   : > { %606 = vst [vmem:[%s1166_s27 + $0x18] sm:$0xff] %v552_v6 }
 0x2b1   : > { %604 = vst [vmem:[%s1166_s27 + $0x8] sm:$0xff] %v544_v8 }
 0x2b3   : > { %v835_v9 = vpop.f32.mrb[20].mxu0 }
 0x2b4   : > { %v565_v10 = vadd.f32 %v835_v9, %v712_v0  ;;  %v556_v11 = vpop.f32.mrb[21].mxu0 }
 0x2b5   : > { %v557_v12 = vadd.f32 %v712_v0, %v556_v11  ;;  %v836_v13 = vpop.f32.mrb[22].mxu0 }
 0x2b6   : > { %609 = vst [vmem:[%s1166_s27 + $0x30] sm:$0xff] %v565_v10  ;;  %v568_v14 = vadd.f32 %v836_v13, %v712_v0  ;;  %v559_v15 = vpop.f32.mrb[23].mxu0 }
 0x2b7   : > { %607 = vst [vmem:[%s1166_s27 + $0x20] sm:$0xff] %v557_v12  ;;  %v560_v16 = vadd.f32 %v712_v0, %v559_v15 }
 0x2b8   : > { %610 = vst [vmem:[%s1166_s27 + $0x38] sm:$0xff] %v568_v14 }
 0x2b9   : > { %608 = vst [vmem:[%s1166_s27 + $0x28] sm:$0xff] %v560_v16 }
 0x2bb   : > { %v839_v17 = vpop.f32.mrb[24].mxu0 }
 0x2bc   : > { %v581_v18 = vadd.f32 %v839_v17, %v712_v0  ;;  %v572_v19 = vpop.f32.mrb[25].mxu0 }
 0x2bd   : > { %v573_v20 = vadd.f32 %v712_v0, %v572_v19  ;;  %v840_v21 = vpop.f32.mrb[26].mxu0 }
 0x2be   : > { %613 = vst [vmem:[%s1166_s27 + $0x50] sm:$0xff] %v581_v18  ;;  %v584_v22 = vadd.f32 %v840_v21, %v712_v0  ;;  %v575_v23 = vpop.f32.mrb[27].mxu0 }
 0x2bf   : > { %611 = vst [vmem:[%s1166_s27 + $0x40] sm:$0xff] %v573_v20  ;;  %v576_v24 = vadd.f32 %v712_v0, %v575_v23 }
 0x2c0   : > { %614 = vst [vmem:[%s1166_s27 + $0x58] sm:$0xff] %v584_v22 }
 0x2c1   : > { %612 = vst [vmem:[%s1166_s27 + $0x48] sm:$0xff] %v576_v24 }
 0x2c3   : > { %v843_v25 = vpop.f32.mrb[28].mxu0 }
 0x2c4   : > { %v597_v26 = vadd.f32 %v843_v25, %v712_v0  ;;  %v588_v27 = vpop.f32.mrb[29].mxu0 }
 0x2c5   : > { %v589_v28 = vadd.f32 %v712_v0, %v588_v27  ;;  %v844_v29 = vpop.f32.mrb[30].mxu0 }
 0x2c6   : > { %617 = vst [vmem:[%s1166_s27 + $0x70] sm:$0xff] %v597_v26  ;;  %v600_v30 = vadd.f32 %v844_v29, %v712_v0  ;;  %v591_v31 = vpop.f32.mrb[31].mxu0 }
 0x2c7   : > { %615 = vst [vmem:[%s1166_s27 + $0x60] sm:$0xff] %v589_v28  ;;  %v592_v32 = vadd.f32 %v712_v0, %v591_v31 }
 0x2c8   : > { %618 = vst [vmem:[%s1166_s27 + $0x78] sm:$0xff] %v600_v30 }
 0x2c9   : > { %616 = vst [vmem:[%s1166_s27 + $0x68] sm:$0xff] %v592_v32 }
 0x2ca   : > { %899 = shalt.err (!%p896_p3)
}
 0x2cb   : > { %s900_s21 = scalar_lea.hbm %s1186_s7, 2048  ;;  %s904_s24 = scalar_lea.hbm %s1238_s2, 4096 }
 0x2cc   : > { %p901_p4 = scmp.ne.s32.totalorder %s1186_s7, %s900_s21  ;;  %p905_p9 = scmp.lt.u32.totalorder %s1186_s7, %s1238_s2 }
 0x2cd   : > { %p906_p10 = scmp.lt.u32.totalorder %s904_s24, %s900_s21  ;;  %p908_p12 = scmp.lt.u32.totalorder %s900_s21, %s1186_s7 }
 0x2ce   : > { %p902_p7 = pnand %p901_p4, %p1006_p5 }
 0x2cf   : > { %p907_p11 = por %p906_p10, %p905_p9 }
 0x2d0   : > { %p903_p8 = pneg %p902_p7 }
 0x2d1   : > { %p909_p13 = por %p908_p12, %p907_p11 }
 0x2d3   : > { %p910_p0 = pnand %p909_p13, %p903_p8 }
 0x2d5   : > { %913 = shalt.err (!%p910_p0)
}
 0x2d6   : > { %s951_s26 = smov 128   ;;  %s952_s29 = smov 8  }
 0x2d7   : > { %845 = dma.vmem_to_hbm [thread:$0]  (%p1006_p5), %s1188_s4, 2048, %s1186_s7, %s1195_s13, %s951_s26, %s951_s26, %s952_s29  }
 0x2d8 PF: > { %p851_p1 = scmp.ge.s32.totalorder %s948_s12, 2  ;;  %s648_s30 = sand.u32 1, %s936_s9  }
 0x2d9   : > { %s649_s27 = scalar_lea.sflag [#allocation3], %s648_s30 }
 0x2da   : > { %p848_p2 = pnand %p851_p1, %p1010_p6 }
 0x2dc   : > { %931 = dma.done.wait (!%p848_p2), %s649_s27, 2048  }
 0x2dd   : > { %933 = vsyncadd (!%p848_p2), %s649_s27, 4294965248  ;;  %p12_p3 = scmp.ge.s32.totalorder %s993_s15, 4   ;;  %s1241_s9 = smov %s940_s10 }
 0x2de   : > { %s1242_s10 = smov %s944_s11  ;;  %s1243_s11 = smov %s1004_s18 }
 0x2df   : > { %s1244_s12 = smov %s993_s15  ;;  %14 = sbr.rel (!%p12_p3) target bundleno = 3 (0x3), region = 63 }
 0x2e6   :  { %654 = vsyncpa [#allocation3], 1 }
 0x2e7   :  { %656 = vsyncpa [#allocation3 + $0x1], 1 }

</bundles_post_ra>
